<compile_context>
chip_gen: v7x
topology: tpu7x:2x2x1
jax: 0.10.0
libtpu: 0.0.40
codegen_flags: <defaults>
</compile_context>

<pallas_src>
import functools

import jax
import jax.numpy as jnp
from jax import lax
from jax.experimental import pallas as pl
from jax.experimental.pallas import tpu as pltpu


NEG_SLOPE = 0.1  # LeakyReLU negative slope used by Conv2dNormRelu


def _lrelu(v):
    return jnp.where(v >= 0, v, NEG_SLOPE * v)


def _round_up(x, m):
    return ((x + m - 1) // m) * m


def _slab_offsets(c2, c3):
    """Column offsets inside the packed weight/bias slab [Cmax, Ktot]."""
    k1a = 0              # W1 columns that multiply [offset_x, offset_y, corr]
    k1b = 3              # W1 columns that multiply nn_feat_3d
    k2 = 3 + c3          # W2
    k3 = k2 + c3         # W3
    k4a = k3 + c3        # W4 columns that multiply the mlp output
    k4b = k4a + c3       # W4 columns that multiply feat_2d
    kb = k4b + c2        # 4 bias columns: b1, b2, b3, b4
    ktot = kb + 4
    return k1a, k1b, k2, k3, k4a, k4b, kb, ktot


def _fuser_math(oc, f3d, f2d, w, c2, c3):
    """Shared 1x1-conv stack (3 mlp layers + fuse), all MXU matmuls with f32 accumulation.

    oc  : [3,  TILE] f32   (offset_x, offset_y, corr)
    f3d : [C3, TILE] f32   gathered nearest-neighbor 3D features
    f2d : [C2, TILE] f32   2D features at the same pixels
    w   : [Cmax, Ktot] f32 packed weight/bias slab (static column layout)
    """
    f32 = jnp.float32
    k1a, k1b, k2, k3, k4a, k4b, kb, _ = _slab_offsets(c2, c3)
    w1a = w[:c3, k1a:k1b]
    w1b = w[:c3, k1b:k2]
    w2 = w[:c3, k2:k3]
    w3 = w[:c3, k3:k4a]
    w4a = w[:c2, k4a:k4b]
    w4b = w[:c2, k4b:kb]
    b1 = w[:c3, kb + 0:kb + 1]
    b2 = w[:c3, kb + 1:kb + 2]
    b3 = w[:c3, kb + 2:kb + 3]
    b4 = w[:c2, kb + 3:kb + 4]

    # mlps: first conv consumes [offset, corr | nn_feat_3d] via split matmuls (no concat)
    h = _lrelu(jnp.dot(w1a, oc, preferred_element_type=f32)
               + jnp.dot(w1b, f3d, preferred_element_type=f32) + b1)
    h = _lrelu(jnp.dot(w2, h, preferred_element_type=f32) + b2)
    h = _lrelu(jnp.dot(w3, h, preferred_element_type=f32) + b3)
    # fuse: conv over cat([mlp_out, feat_2d]) realized as split matmuls
    y = (jnp.dot(w4a, h, preferred_element_type=f32)
         + jnp.dot(w4b, f2d, preferred_element_type=f32) + b4)
    return _lrelu(y)


def fuser_kernel_pregathered(oc_ref, f3d_ref, f2d_ref, w_ref, o_ref, *, c2, c3):
    """Large-N path: offsets/corr + gathered features were produced by an XLA gather."""
    oc = oc_ref[...].astype(jnp.float32)    # [3,  TILE] f32
    f3d = f3d_ref[...].astype(jnp.float32)  # [C3, TILE] (streamed as bf16)
    f2d = f2d_ref[...].astype(jnp.float32)  # [C2, TILE]
    w = w_ref[...]
    o_ref[...] = _fuser_math(oc, f3d, f2d, w, c2, c3).astype(o_ref.dtype)


def fuser_kernel_gather(idx_ref, xy_ref, f3d_pts_ref, f2d_ref, w_ref, o_ref,
                        *, c2, c3, n_pts, img_w, tile):
    """Small-N path: NN gather + offset/corr are built in-kernel (one-hot on the MXU)."""
    f32 = jnp.float32
    w = w_ref[...]
    idxv = idx_ref[...]                                                   # [1, TILE] int32
    onehot = (lax.broadcasted_iota(jnp.int32, (n_pts, tile), 0) == idxv).astype(f32)
    nn_xy = jnp.dot(xy_ref[...], onehot, preferred_element_type=f32)      # [2,  TILE]
    f3d = jnp.dot(f3d_pts_ref[...].astype(f32), onehot,
                  preferred_element_type=f32)                             # [C3, TILE]

    # pixel-grid coordinates of this tile (x = column, y = row of the flattened H*W grid)
    p = pl.program_id(0) * tile + lax.broadcasted_iota(jnp.int32, (1, tile), 1)
    p_f = p.astype(f32)
    gy = jnp.floor((p_f + 0.5) * (1.0 / img_w))     # robust vector "p // W" in f32
    gx = p_f - gy * img_w                           # "p % W"
    offx = nn_xy[0:1, :] - gx
    offy = nn_xy[1:2, :] - gy
    # TODO(synk): exact nn_corr formula of project_feat_with_nn_corr is unavailable;
    # using squared pixel distance to the nearest projected point as a placeholder.
    corr = offx * offx + offy * offy
    oc = jnp.concatenate([offx, offy, corr], axis=0)                      # [3, TILE]

    f2d = f2d_ref[...].astype(f32)
    o_ref[...] = _fuser_math(oc, f3d, f2d, w, c2, c3).astype(o_ref.dtype)


@functools.partial(jax.jit,
                   static_argnames=("tile", "out_dtype", "feat_dtype", "gather_in_kernel"))
def pyramid_feature_fuser_2d(xy, feat_2d, feat_3d, nn_proj, params, *,
                             tile=None, out_dtype=jnp.bfloat16,
                             feat_dtype=jnp.bfloat16, gather_in_kernel=None):
    """JAX wrapper reproducing PyramidFeatureFuser2D.forward.

    xy      : [B, 2, N]   projected pixel coordinates of the 3D points (x, y)
    feat_2d : [B, C2, H, W]
    feat_3d : [B, C3, N]
    nn_proj : [B, H*W, k] int indices of nearest 3D point per pixel (only [..., 0] used)
    params  : packed weight slab from init_params / pack_params
    returns : [B, C2, H, W] in out_dtype (bf16 by default to halve output HBM traffic)
    """
    B, C2, H, W = feat_2d.shape
    C3, N = feat_3d.shape[1], feat_3d.shape[2]
    HW = H * W

    if gather_in_kernel is None:
        # the in-kernel one-hot gather only pays for itself for small point counts
        gather_in_kernel = N <= 128

    if tile is None:
        tile = min(8192, _round_up(HW, 128))
        if gather_in_kernel:
            # keep the in-kernel one-hot ([N, TILE] f32) comfortably inside VMEM
            tile = min(tile, max(512, ((1 << 20) // max(N, 1)) // 128 * 128))
        if B == 1 and HW <= tile and HW > 128:
            # single-batch call: expose >= 2 parallel tiles (v7x megacore)
            tile = _round_up(pl.cdiv(HW, 2), 128)
    assert tile % 128 == 0 or tile == HW, tile
    n_tiles = pl.cdiv(HW, tile)   # ragged last tile handled by Pallas (masked stores)

    # NOTE: assumes nn_proj holds valid indices; a sentinel (e.g. -1 for "no projection")
    # would need explicit masking rather than this clip.
    idx = jnp.clip(nn_proj[..., 0].astype(jnp.int32), 0, N - 1)           # [B, HW]

    cmax = max(C2, C3)
    *_, ktot = _slab_offsets(C2, C3)
    w_slab = params.astype(jnp.float32)
    assert w_slab.shape == (cmax, ktot), w_slab.shape

    f2d_flat = feat_2d.reshape(B, C2, HW)            # free reshape, pixels stay on lanes

    def pix_spec(c):   # [B, c, HW] -> per-step [c, tile]: channels on sublanes, lane-dense
        return pl.BlockSpec((None, c, tile), lambda j, b: (b, 0, j))

    w_spec = pl.BlockSpec((cmax, ktot), lambda j, b: (0, 0))               # resident slab
    out_bytes = B * C2 * HW * jnp.dtype(out_dtype).itemsize
    mm_flops_px = 2 * (C3 * (C3 + 3) + 2 * C3 * C3 + C2 * (C2 + C3))

    if gather_in_kernel:
        # Fused path: only the 4 B/px index stream + feat_2d cross HBM per pixel.
        xy_in = xy.astype(jnp.float32)               # [B, 2, N]  tiny, resident per batch
        f3d_in = feat_3d.astype(feat_dtype)          # [B, C3, N] tiny, resident per batch
        idx_in = idx[:, None, :]                     # [B, 1, HW] int32, pixels on lanes
        kernel = functools.partial(fuser_kernel_gather, c2=C2, c3=C3,
                                   n_pts=N, img_w=W, tile=tile)
        in_specs = [pix_spec(1),
                    pl.BlockSpec((None, 2, N), lambda j, b: (b, 0, 0)),
                    pl.BlockSpec((None, C3, N), lambda j, b: (b, 0, 0)),
                    pix_spec(C2),
                    w_spec]
        operands = (idx_in, xy_in, f3d_in, f2d_flat, w_slab)
        flops = B * HW * (mm_flops_px + 2 * (2 + C3) * N)
        bytes_accessed = (idx_in.size * 4 + xy_in.size * 4
                          + f3d_in.size * f3d_in.dtype.itemsize
                          + f2d_flat.size * f2d_flat.dtype.itemsize
                          + w_slab.size * 4 + out_bytes)
    else:
        # Fallback path (large N): one XLA gather pass; features streamed bf16, offsets f32.
        f32 = jnp.float32
        ys, xs = jnp.meshgrid(jnp.arange(H, dtype=f32), jnp.arange(W, dtype=f32),
                              indexing="ij")
        grid_xy = jnp.stack([xs.reshape(-1), ys.reshape(-1)], axis=0)      # [2, HW] (x, y)
        nn_xy = jnp.take_along_axis(xy.astype(f32), idx[:, None, :], axis=2)   # [B,2,HW]
        nn_off = nn_xy - grid_xy[None]
        # TODO(synk): exact nn_corr of project_feat_with_nn_corr unavailable; squared dist.
        nn_corr = jnp.sum(nn_off * nn_off, axis=1, keepdims=True)
        off_corr = jnp.concatenate([nn_off, nn_corr], axis=1)              # [B,3,HW] f32
        nn_f3d = jnp.take_along_axis(feat_3d.astype(feat_dtype),
                                     idx[:, None, :], axis=2)              # [B,C3,HW] bf16
        kernel = functools.partial(fuser_kernel_pregathered, c2=C2, c3=C3)
        in_specs = [pix_spec(3), pix_spec(C3), pix_spec(C2), w_spec]
        operands = (off_corr, nn_f3d, f2d_flat, w_slab)
        flops = B * HW * mm_flops_px
        bytes_accessed = (off_corr.size * 4
                          + nn_f3d.size * nn_f3d.dtype.itemsize
                          + f2d_flat.size * f2d_flat.dtype.itemsize
                          + w_slab.size * 4 + out_bytes)

    out_flat = pl.pallas_call(
        kernel,
        out_shape=jax.ShapeDtypeStruct((B, C2, HW), out_dtype),
        grid_spec=pltpu.PrefetchScalarGridSpec(
            num_scalar_prefetch=0,
            grid=(n_tiles, B),          # tiles leading -> megacore split even when B == 1
            in_specs=in_specs,
            out_specs=pix_spec(C2),
        ),
        compiler_params=pltpu.CompilerParams(
            dimension_semantics=("parallel", "parallel")),
        cost_estimate=pl.CostEstimate(flops=int(flops), transcendentals=0,
                                      bytes_accessed=int(bytes_accessed)),
    )(*operands)

    return out_flat.reshape(B, C2, H, W)


def pack_params(w1, b1, w2, b2, w3, b3, w4, b4):
    """Pack the four Conv2dNormRelu (1x1, norm=None) layers into one f32 slab [Cmax, Ktot].

    Column layout (matches _slab_offsets / _fuser_math):
      [ W1 (3 offset/corr cols | C3 nn_feat_3d cols) | W2 | W3 |
        W4 (C3 mlp-out cols | C2 feat_2d cols) | b1 b2 b3 b4 ]
    Rows beyond a layer's Cout are zero-padded.
    """
    c3 = w2.shape[0]
    c2 = w4.shape[0]
    k1a, _, k2, k3, k4a, _, kb, ktot = _slab_offsets(c2, c3)
    cmax = max(c2, c3)
    slab = jnp.zeros((cmax, ktot), jnp.float32)
    slab = slab.at[:c3, k1a:k2].set(w1.astype(jnp.float32))
    slab = slab.at[:c3, k2:k3].set(w2.astype(jnp.float32))
    slab = slab.at[:c3, k3:k4a].set(w3.astype(jnp.float32))
    slab = slab.at[:c2, k4a:kb].set(w4.astype(jnp.float32))
    slab = slab.at[:c3, kb + 0].set(b1.astype(jnp.float32))
    slab = slab.at[:c3, kb + 1].set(b2.astype(jnp.float32))
    slab = slab.at[:c3, kb + 2].set(b3.astype(jnp.float32))
    slab = slab.at[:c2, kb + 3].set(b4.astype(jnp.float32))
    return slab


def init_params(key, in_channels_2d, in_channels_3d):
    """Deterministic init of the 4 conv layers (PyTorch-style 1/sqrt(fan_in) bounds)."""
    c2, c3 = in_channels_2d, in_channels_3d

    def conv_init(k, cout, cin):
        kw, kb = jax.random.split(k)
        bound = 1.0 / (cin ** 0.5)
        w = jax.random.uniform(kw, (cout, cin), jnp.float32, -bound, bound)
        b = jax.random.uniform(kb, (cout,), jnp.float32, -bound, bound)
        return w, b

    k1, k2, k3, k4 = jax.random.split(key, 4)
    w1, b1 = conv_init(k1, c3, c3 + 3)      # consumes [offset(2), corr(1), nn_feat_3d(C3)]
    w2, b2 = conv_init(k2, c3, c3)
    w3, b3 = conv_init(k3, c3, c3)
    w4, b4 = conv_init(k4, c2, c2 + c3)     # consumes cat([mlp_out(C3), feat_2d(C2)])
    return pack_params(w1, b1, w2, b2, w3, b3, w4, b4)


if __name__ == "__main__":
    B, H, W = 2, 16, 16
    C2D, C3D = 32, 16      # in_channels_2d, in_channels_3d
    N = 64                 # number of 3D points
    K = 3                  # neighbors stored in nn_proj (only [..., 0] is used)

    key = jax.random.PRNGKey(0)
    k_xy, k_f2d, k_f3d, k_nn, k_params = jax.random.split(key, 5)

    xy = jax.random.uniform(k_xy, (B, 2, N), jnp.float32, 0.0, float(W))
    feat_2d = jax.random.normal(k_f2d, (B, C2D, H, W), jnp.float32)
    feat_3d = jax.random.normal(k_f3d, (B, C3D, N), jnp.float32)
    nn_proj = jax.random.randint(k_nn, (B, H * W, K), 0, N, jnp.int32)

    params = init_params(k_params, C2D, C3D)

    # Fused in-kernel NN-gather path (small N) ...
    out_fused = pyramid_feature_fuser_2d(xy, feat_2d, feat_3d, nn_proj, params,
                                         gather_in_kernel=True)
    # ... and the XLA-gather fallback path (large N), used here as a cross-check.
    out_gathered = pyramid_feature_fuser_2d(xy, feat_2d, feat_3d, nn_proj, params,
                                            gather_in_kernel=False)
    out_fused, out_gathered = jax.block_until_ready((out_fused, out_gathered))

    assert out_fused.shape == (B, C2D, H, W), out_fused.shape
    assert out_gathered.shape == (B, C2D, H, W), out_gathered.shape
    a = out_fused.astype(jnp.float32)
    b = out_gathered.astype(jnp.float32)
    assert bool(jnp.all(jnp.isfinite(a))) and bool(jnp.all(jnp.isfinite(b)))
    assert bool(jnp.allclose(a, b, atol=2e-2, rtol=2e-2)), \
        float(jnp.max(jnp.abs(a - b)))
    print("KERNEL_OK")
</pallas_src>

<mosaic_0001>
module attributes {stable_mosaic.version = 11 : i64} {
  func.func @fuser_kernel_gather(%arg0: i32, %arg1: i32, %arg2: memref<1x1x256xi32, #tpu.memory_space<vmem>>, %arg3: memref<1x2x64xf32, #tpu.memory_space<vmem>>, %arg4: memref<1x16x64xbf16, #tpu.memory_space<vmem>>, %arg5: memref<1x32x256xf32, #tpu.memory_space<vmem>>, %arg6: memref<32x103xf32, #tpu.memory_space<vmem>>, %arg7: memref<1x32x256xbf16, #tpu.memory_space<vmem>>) attributes {dimension_semantics = [#tpu.dimension_semantics<parallel>, #tpu.dimension_semantics<parallel>], iteration_bounds = array<i64: 1, 2>, scalar_prefetch = 0 : i64, scratch_operands = 0 : i64, tpu.core_type = #tpu.core_type<tc>, window_params = [{transform_indices = @transform_0, window_bounds = array<i64: 1, 1, 256>}, {transform_indices = @transform_1, window_bounds = array<i64: 1, 2, 64>}, {transform_indices = @transform_2, window_bounds = array<i64: 1, 16, 64>}, {transform_indices = @transform_3, window_bounds = array<i64: 1, 32, 256>}, {pipeline_mode = #tpu.pipeline_mode<synchronous>, transform_indices = @transform_4, window_bounds = array<i64: 32, 103>}, {transform_indices = @transform_5, window_bounds = array<i64: 1, 32, 256>}]} {
    %c0 = arith.constant 0 : index
    %c0_0 = arith.constant 0 : index
    %0 = vector.load %arg6[%c0, %c0_0] : memref<32x103xf32, #tpu.memory_space<vmem>>, vector<32x103xf32>
    %c0_1 = arith.constant 0 : index
    %c0_2 = arith.constant 0 : index
    %c0_3 = arith.constant 0 : index
    %1 = vector.load %arg2[%c0_1, %c0_2, %c0_3] : memref<1x1x256xi32, #tpu.memory_space<vmem>>, vector<1x1x256xi32>
    %2 = vector.shape_cast %1 : vector<1x1x256xi32> to vector<1x256xi32>
    %3 = tpu.iota {dimensions = array<i32: 0>} : vector<64x256xi32>
    %4 = vector.broadcast %2 : vector<1x256xi32> to vector<64x256xi32>
    %5 = arith.cmpi eq, %3, %4 : vector<64x256xi32>
    %6 = arith.extui %5 : vector<64x256xi1> to vector<64x256xi32>
    %7 = arith.sitofp %6 : vector<64x256xi32> to vector<64x256xf32>
    %c0_4 = arith.constant 0 : index
    %c0_5 = arith.constant 0 : index
    %c0_6 = arith.constant 0 : index
    %8 = vector.load %arg3[%c0_4, %c0_5, %c0_6] : memref<1x2x64xf32, #tpu.memory_space<vmem>>, vector<1x2x64xf32>
    %9 = vector.shape_cast %8 : vector<1x2x64xf32> to vector<2x64xf32>
    %cst = arith.constant dense<0.000000e+00> : vector<2x256xf32>
    %10 = tpu.matmul %9, %7, %cst {dimension_numbers = #tpu.dot_dimension_numbers<[1], [0], [0], [1], [0, 0, 1, 1], [], []>} : vector<2x64xf32>, vector<64x256xf32>, vector<2x256xf32> -> vector<2x256xf32>
    %c0_7 = arith.constant 0 : index
    %c0_8 = arith.constant 0 : index
    %c0_9 = arith.constant 0 : index
    %11 = vector.load %arg4[%c0_7, %c0_8, %c0_9] : memref<1x16x64xbf16, #tpu.memory_space<vmem>>, vector<1x16x64xbf16>
    %12 = vector.shape_cast %11 : vector<1x16x64xbf16> to vector<16x64xbf16>
    %13 = arith.extf %12 : vector<16x64xbf16> to vector<16x64xf32>
    %cst_10 = arith.constant dense<0.000000e+00> : vector<16x256xf32>
    %14 = tpu.matmul %13, %7, %cst_10 {dimension_numbers = #tpu.dot_dimension_numbers<[1], [0], [0], [1], [0, 0, 1, 1], [], []>} : vector<16x64xf32>, vector<64x256xf32>, vector<16x256xf32> -> vector<16x256xf32>
    %c256_i32 = arith.constant 256 : i32
    %15 = arith.muli %arg0, %c256_i32 : i32
    %16 = tpu.iota {dimensions = array<i32: 1>} : vector<1x256xi32>
    %17 = vector.broadcast %15 : i32 to vector<1x256xi32>
    %18 = arith.addi %17, %16 : vector<1x256xi32>
    %19 = arith.sitofp %18 : vector<1x256xi32> to vector<1x256xf32>
    %cst_11 = arith.constant 5.000000e-01 : f32
    %20 = vector.broadcast %cst_11 : f32 to vector<1x256xf32>
    %21 = arith.addf %19, %20 : vector<1x256xf32>
    %cst_12 = arith.constant 6.250000e-02 : f32
    %22 = vector.broadcast %cst_12 : f32 to vector<1x256xf32>
    %23 = arith.mulf %21, %22 : vector<1x256xf32>
    %24 = math.floor %23 : vector<1x256xf32>
    %cst_13 = arith.constant 1.600000e+01 : f32
    %25 = vector.broadcast %cst_13 : f32 to vector<1x256xf32>
    %26 = arith.mulf %24, %25 : vector<1x256xf32>
    %27 = arith.subf %19, %26 : vector<1x256xf32>
    %28 = vector.extract_strided_slice %10 {offsets = [0, 0], sizes = [1, 256], strides = [1, 1]} : vector<2x256xf32> to vector<1x256xf32>
    %29 = arith.subf %28, %27 : vector<1x256xf32>
    %30 = vector.extract_strided_slice %10 {offsets = [1, 0], sizes = [1, 256], strides = [1, 1]} : vector<2x256xf32> to vector<1x256xf32>
    %31 = arith.subf %30, %24 : vector<1x256xf32>
    %32 = arith.mulf %29, %29 : vector<1x256xf32>
    %33 = arith.mulf %31, %31 : vector<1x256xf32>
    %34 = arith.addf %32, %33 : vector<1x256xf32>
    %35 = tpu.concatenate %29, %31, %34 in 0 : vector<1x256xf32>, vector<1x256xf32>, vector<1x256xf32> -> vector<3x256xf32>
    %c0_14 = arith.constant 0 : index
    %c0_15 = arith.constant 0 : index
    %c0_16 = arith.constant 0 : index
    %36 = vector.load %arg5[%c0_14, %c0_15, %c0_16] : memref<1x32x256xf32, #tpu.memory_space<vmem>>, vector<1x32x256xf32>
    %37 = vector.shape_cast %36 : vector<1x32x256xf32> to vector<32x256xf32>
    %38 = vector.extract_strided_slice %0 {offsets = [0, 0], sizes = [16, 3], strides = [1, 1]} : vector<32x103xf32> to vector<16x3xf32>
    %39 = vector.extract_strided_slice %0 {offsets = [0, 3], sizes = [16, 16], strides = [1, 1]} : vector<32x103xf32> to vector<16x16xf32>
    %40 = vector.extract_strided_slice %0 {offsets = [0, 19], sizes = [16, 16], strides = [1, 1]} : vector<32x103xf32> to vector<16x16xf32>
    %41 = vector.extract_strided_slice %0 {offsets = [0, 35], sizes = [16, 16], strides = [1, 1]} : vector<32x103xf32> to vector<16x16xf32>
    %42 = vector.extract_strided_slice %0 {offsets = [0, 51], sizes = [32, 16], strides = [1, 1]} : vector<32x103xf32> to vector<32x16xf32>
    %43 = vector.extract_strided_slice %0 {offsets = [0, 67], sizes = [32, 32], strides = [1, 1]} : vector<32x103xf32> to vector<32x32xf32>
    %44 = vector.extract_strided_slice %0 {offsets = [0, 99], sizes = [16, 1], strides = [1, 1]} : vector<32x103xf32> to vector<16x1xf32>
    %45 = vector.extract_strided_slice %0 {offsets = [0, 100], sizes = [16, 1], strides = [1, 1]} : vector<32x103xf32> to vector<16x1xf32>
    %46 = vector.extract_strided_slice %0 {offsets = [0, 101], sizes = [16, 1], strides = [1, 1]} : vector<32x103xf32> to vector<16x1xf32>
    %47 = vector.extract_strided_slice %0 {offsets = [0, 102], sizes = [32, 1], strides = [1, 1]} : vector<32x103xf32> to vector<32x1xf32>
    %cst_17 = arith.constant dense<0.000000e+00> : vector<16x256xf32>
    %48 = tpu.matmul %38, %35, %cst_17 {dimension_numbers = #tpu.dot_dimension_numbers<[1], [0], [0], [1], [0, 0, 1, 1], [], []>} : vector<16x3xf32>, vector<3x256xf32>, vector<16x256xf32> -> vector<16x256xf32>
    %cst_18 = arith.constant dense<0.000000e+00> : vector<16x256xf32>
    %49 = tpu.matmul %39, %14, %cst_18 {dimension_numbers = #tpu.dot_dimension_numbers<[1], [0], [0], [1], [0, 0, 1, 1], [], []>} : vector<16x16xf32>, vector<16x256xf32>, vector<16x256xf32> -> vector<16x256xf32>
    %50 = arith.addf %48, %49 : vector<16x256xf32>
    %51 = vector.broadcast %44 : vector<16x1xf32> to vector<16x256xf32>
    %52 = arith.addf %50, %51 : vector<16x256xf32>
    %cst_19 = arith.constant 0.000000e+00 : f32
    %53 = vector.broadcast %cst_19 : f32 to vector<16x256xf32>
    %54 = arith.cmpf oge, %52, %53 : vector<16x256xf32>
    %cst_20 = arith.constant 1.000000e-01 : f32
    %55 = vector.broadcast %cst_20 : f32 to vector<16x256xf32>
    %56 = arith.mulf %55, %52 : vector<16x256xf32>
    %57 = arith.select %54, %52, %56 : vector<16x256xi1>, vector<16x256xf32>
    %cst_21 = arith.constant dense<0.000000e+00> : vector<16x256xf32>
    %58 = tpu.matmul %40, %57, %cst_21 {dimension_numbers = #tpu.dot_dimension_numbers<[1], [0], [0], [1], [0, 0, 1, 1], [], []>} : vector<16x16xf32>, vector<16x256xf32>, vector<16x256xf32> -> vector<16x256xf32>
    %59 = vector.broadcast %45 : vector<16x1xf32> to vector<16x256xf32>
    %60 = arith.addf %58, %59 : vector<16x256xf32>
    %cst_22 = arith.constant 0.000000e+00 : f32
    %61 = vector.broadcast %cst_22 : f32 to vector<16x256xf32>
    %62 = arith.cmpf oge, %60, %61 : vector<16x256xf32>
    %cst_23 = arith.constant 1.000000e-01 : f32
    %63 = vector.broadcast %cst_23 : f32 to vector<16x256xf32>
    %64 = arith.mulf %63, %60 : vector<16x256xf32>
    %65 = arith.select %62, %60, %64 : vector<16x256xi1>, vector<16x256xf32>
    %cst_24 = arith.constant dense<0.000000e+00> : vector<16x256xf32>
    %66 = tpu.matmul %41, %65, %cst_24 {dimension_numbers = #tpu.dot_dimension_numbers<[1], [0], [0], [1], [0, 0, 1, 1], [], []>} : vector<16x16xf32>, vector<16x256xf32>, vector<16x256xf32> -> vector<16x256xf32>
    %67 = vector.broadcast %46 : vector<16x1xf32> to vector<16x256xf32>
    %68 = arith.addf %66, %67 : vector<16x256xf32>
    %cst_25 = arith.constant 0.000000e+00 : f32
    %69 = vector.broadcast %cst_25 : f32 to vector<16x256xf32>
    %70 = arith.cmpf oge, %68, %69 : vector<16x256xf32>
    %cst_26 = arith.constant 1.000000e-01 : f32
    %71 = vector.broadcast %cst_26 : f32 to vector<16x256xf32>
    %72 = arith.mulf %71, %68 : vector<16x256xf32>
    %73 = arith.select %70, %68, %72 : vector<16x256xi1>, vector<16x256xf32>
    %cst_27 = arith.constant dense<0.000000e+00> : vector<32x256xf32>
    %74 = tpu.matmul %42, %73, %cst_27 {dimension_numbers = #tpu.dot_dimension_numbers<[1], [0], [0], [1], [0, 0, 1, 1], [], []>} : vector<32x16xf32>, vector<16x256xf32>, vector<32x256xf32> -> vector<32x256xf32>
    %cst_28 = arith.constant dense<0.000000e+00> : vector<32x256xf32>
    %75 = tpu.matmul %43, %37, %cst_28 {dimension_numbers = #tpu.dot_dimension_numbers<[1], [0], [0], [1], [0, 0, 1, 1], [], []>} : vector<32x32xf32>, vector<32x256xf32>, vector<32x256xf32> -> vector<32x256xf32>
    %76 = arith.addf %74, %75 : vector<32x256xf32>
    %77 = vector.broadcast %47 : vector<32x1xf32> to vector<32x256xf32>
    %78 = arith.addf %76, %77 : vector<32x256xf32>
    %cst_29 = arith.constant 0.000000e+00 : f32
    %79 = vector.broadcast %cst_29 : f32 to vector<32x256xf32>
    %80 = arith.cmpf oge, %78, %79 : vector<32x256xf32>
    %cst_30 = arith.constant 1.000000e-01 : f32
    %81 = vector.broadcast %cst_30 : f32 to vector<32x256xf32>
    %82 = arith.mulf %81, %78 : vector<32x256xf32>
    %83 = arith.select %80, %78, %82 : vector<32x256xi1>, vector<32x256xf32>
    %84 = arith.truncf %83 : vector<32x256xf32> to vector<32x256xbf16>
    %c0_31 = arith.constant 0 : index
    %c0_32 = arith.constant 0 : index
    %c0_33 = arith.constant 0 : index
    %85 = vector.load %arg7[%c0_31, %c0_32, %c0_33] : memref<1x32x256xbf16, #tpu.memory_space<vmem>>, vector<1x32x256xbf16>
    %86 = vector.shape_cast %85 : vector<1x32x256xbf16> to vector<32x256xbf16>
    %87 = vector.shape_cast %84 : vector<32x256xbf16> to vector<1x32x256xbf16>
    tpu.vector_store %arg7[%c0_31, %c0_32, %c0_33], %87 {strides = array<i32>} : memref<1x32x256xbf16, #tpu.memory_space<vmem>>, vector<1x32x256xbf16>,
    return
  }
  func.func @transform_0(%arg0: i32, %arg1: i32) -> (i32, i32, i32) {
    %c0_i32 = arith.constant 0 : i32
    %c0_i32_0 = arith.constant 0 : i32
    return %arg1, %c0_i32, %arg0 : i32, i32, i32
  }
  func.func @transform_1(%arg0: i32, %arg1: i32) -> (i32, i32, i32) {
    %c0_i32 = arith.constant 0 : i32
    %c0_i32_0 = arith.constant 0 : i32
    %c0_i32_1 = arith.constant 0 : i32
    return %arg1, %c0_i32, %c0_i32_0 : i32, i32, i32
  }
  func.func @transform_2(%arg0: i32, %arg1: i32) -> (i32, i32, i32) {
    %c0_i32 = arith.constant 0 : i32
    %c0_i32_0 = arith.constant 0 : i32
    %c0_i32_1 = arith.constant 0 : i32
    return %arg1, %c0_i32, %c0_i32_0 : i32, i32, i32
  }
  func.func @transform_3(%arg0: i32, %arg1: i32) -> (i32, i32, i32) {
    %c0_i32 = arith.constant 0 : i32
    %c0_i32_0 = arith.constant 0 : i32
    return %arg1, %c0_i32, %arg0 : i32, i32, i32
  }
  func.func @transform_4(%arg0: i32, %arg1: i32) -> (i32, i32) {
    %c0_i32 = arith.constant 0 : i32
    %c0_i32_0 = arith.constant 0 : i32
    %c0_i32_1 = arith.constant 0 : i32
    return %c0_i32, %c0_i32_0 : i32, i32
  }
  func.func @transform_5(%arg0: i32, %arg1: i32) -> (i32, i32, i32) {
    %c0_i32 = arith.constant 0 : i32
    %c0_i32_0 = arith.constant 0 : i32
    return %arg1, %c0_i32, %arg0 : i32, i32, i32
  }
}

</mosaic_0001>

<bundles_post_ra>
// kernel: pyramid_feature_fuser_2d.1
= control target key start
LH: loop header
LB: loop body
LE: loop exit
PB: predicated region body
PF: predicated region fallthrough
CT: control target
= control target key end

     0   :  { %s1722_s18 = smov 0   ;;  %s1724_s19 = smov 0   ;;  %s1919_s0 = inlined_call_operand.vmem [shape: s32[2,1,256], index: 0, kind: input, shape index: {}]   ;;  %s1920_s1 = inlined_call_operand.vmem [shape: f32[2,2,64], index: 1, kind: input, shape index: {}]   ;;  %s1921_s2 = inlined_call_operand.vmem [shape: bf16[2,16,64], index: 2, kind: input, shape index: {}]   ;;  %s1922_s3 = inlined_call_operand.vmem [shape: f32[2,32,256], index: 3, kind: input, shape index: {}]   ;;  %s1923_s4 = inlined_call_operand.vmem [shape: f32[32,103], index: 4, kind: input, shape index: {}]   ;;  %s1924_s5 = inlined_call_operand.vmem [shape: bf16[2,32,256], index: 5, kind: output, shape index: {}]  }
   0x1   :  { %s1726_s20 = smov 0  }
   0x2 LB: > { %s24_s21 = sadd.s32 1, %s1675_s19  ;;  %p1452_p0 = scmp.ge.s32.totalorder %s1679_s20, 1  ;;  %s1679_s20 = sphi %s1726_s20, %s15_s20   ;;  %s1675_s19 = sphi %s1724_s19, %s1942_s19   ;;  %s1671_s18 = sphi %s1722_s18, %s1941_s18  }
   0x3   : > { %p25_p1 = scmp.ge.s32.totalorder %s24_s21, 2  ;;  %p243_p2 = scmp.lt.s32.totalorder %s1679_s20, 3 }
   0x5   : > { %s1944_s21 = smov (%p25_p1, %s24_s21), 0  ;;  %p244_p3 = pnand %p1452_p0, %p243_p2 }
   0x6   : > { %p297_p4 = scmp.lt.s32.totalorder (!%p244_p3), %s1671_s18, 1  ;;  %v339_v0 = vlaneseq (!%p244_p3)  ;;  %v1743_v1 = vld [vmem:[%s1923_s4] sm:$0xff] (!%p244_p3)  ;;  %v1681_v2 = vmov (!%p244_p3), 0.0   ;;  %s1682_s24 = smov (!%p244_p3), 125   ;;  %v1754_v4 = vld [vmem:[%s1923_s4 + $0x8] sm:$0xff] (!%p244_p3)  ;;  %v1684_v30 = vmov (!%p244_p3), 99  }
   0x7   : > { %247 = sbr.rel (%p244_p3) target bundleno = 1202 (0x4b2), region = 40  ;;  %473 = vmatprep.mubr.f32.mxu1 (!%p244_p3), %v1681_v2  ;;  %697 = vmatprep.mubr.f32.mxu0 (!%p244_p3), %v1681_v2  ;;  %v1683_v16 = vmov (!%p244_p3), 1.0|1.0   ;;  %s1685_s13 = smov (!%p244_p3), 109  }
   0x8   : > { %v340_v3 = vshrl.u32 (!%p244_p3), %v339_v0, 7  ;;  %624 = vrot.lane.b32.xlu0 (!%p244_p3), %v1743_v1, %s1682_s24  ;;  %1650 = vset.pattern.permute.xlu1 (!%p244_p3), %v1684_v30  ;;  %v569_v31 = vand.u32 (!%p244_p3), 127, %v339_v0  ;;  %s1687_s14 = smov (!%p244_p3), 93   ;;  %s1689_s25 = smov (!%p244_p3), 61  }
   0x9   : > { %800 = vperm.xlu1 (!%p244_p3), %1650, %v1743_v1   ;;  %s1690_s26 = smov (!%p244_p3), 77  }
   0xa   : > { %v354_v5 = vsub.s32 (!%p244_p3), 1, %v340_v3  ;;  %v350_v6 = vsub.s32 (!%p244_p3), 0, %v340_v3  ;;  %v341_v7 = vadd.s32 (!%p244_p3), 8, %v340_v3  ;;  %v342_v9 = vadd.s32 (!%p244_p3), 16, %v340_v3 }
   0xb   : > { %v343_v10 = vadd.s32 (!%p244_p3), 24, %v340_v3  ;;  %v344_v13 = vadd.s32 (!%p244_p3), 32, %v340_v3  ;;  %v345_v14 = vadd.s32 (!%p244_p3), 40, %v340_v3  ;;  %v346_v18 = vadd.s32 (!%p244_p3), 48, %v340_v3 }
   0xc   : > { %626 = vrot.lane.b32.xlu0 (!%p244_p3), %v1754_v4, %s1682_s24  ;;  %v347_v19 = vadd.s32 (!%p244_p3), 56, %v340_v3  ;;  %v570_v32 = vadd.s32 (!%p244_p3), 128, %v569_v31  ;;  %v574_v34 = vcvt.s32.f32 (!%p244_p3), %v569_v31 }
   0xd   : > { %804 = vperm.xlu1 (!%p244_p3), %1650, %v1754_v4  }
   0xe   : > { %s1946_s18 = smov (!%p297_p4, %s1671_s18), 1  ;;  %v575_v33 = vcvt.s32.f32 %v570_v32  ;;  %v576_v36 = vadd.f32 0.5, %v574_v34 }
   0xf   : > { %s1453_s27 = sshll.u32 %s1946_s18, 1  ;;  %s1536_s9 = sshll.u32 %s1946_s18, 3 }
  0x10   : > { %s303_s30 = scalar_lea.vmem %s1919_s0, %s1453_s27  ;;  %s308_s8 = scalar_lea.vmem %s1920_s1, %s1453_s27  ;;  %831 = vrot.lane.b32.xlu0 %v1743_v1, %s1685_s13  ;;  %v577_v35 = vadd.f32 0.5, %v575_v33  ;;  %v578_v38 = vmul.f32 0.0625, %v576_v36  ;;  %v1869_v36 = vld [vmem:[%s1923_s4 + $0x10] sm:$0xff] }
  0x11   : > { %v338_v8 = vld [vmem:[%s303_s30] sm:$0x3]  ;;  %s313_s12 = scalar_lea.vmem %s1921_s2, %s1536_s9  ;;  %833 = vrot.lane.b32.xlu1 %v1754_v4, %s1685_s13  ;;  %s1537_s15 = sshll.u32 %s1946_s18, 6 }
  0x12   : > { %v355_v11 = vrot.slane %v338_v8, %v354_v5  ;;  %v351_v12 = vrot.slane %v338_v8, %v350_v6  ;;  %v404_v26 = vld [vmem:[%s308_s8] sm:$0x3]  ;;  %v579_v37 = vmul.f32 0.0625, %v577_v35  ;;  %v580_v41 = vfloor.f32 %v578_v38  ;;  %s322_s24 = scalar_lea.vmem %s1922_s3, %s1537_s15  ;;  %s1538_s29 = sshll.u32 %s1946_s18, 5 }
  0x13   : > { %v1544_v27 = vld [vmem:[%s313_s12] sm:$0xff]   ;;  %v1688_v35 = vmov 101   ;;  %v617_v38 = vld [vmem:[%s322_s24 + $0x18] sm:$0xff]  ;;  %s1904_s7 = scalar_lea.vmem %s1924_s5, %s1538_s29 }
  0x14   : > { %vm357_vm0 = vcmp.eq.s32.totalorder %v340_v3, %v355_v11  ;;  %vm359_vm1 = vcmp.eq.s32.totalorder %v341_v7, %v355_v11  ;;  %vm356_vm2 = vcmp.eq.s32.totalorder %v340_v3, %v351_v12  ;;  %vm358_vm3 = vcmp.eq.s32.totalorder %v341_v7, %v351_v12 }
  0x15   : > { %vm1763_vm4 = vmpackc.low %vm359_vm1, %vm357_vm0  ;;  %vm361_vm5 = vcmp.eq.s32.totalorder %v342_v9, %v355_v11  ;;  %vm363_vm6 = vcmp.eq.s32.totalorder %v343_v10, %v355_v11  ;;  %vm360_vm7 = vcmp.eq.s32.totalorder %v342_v9, %v351_v12  ;;  %vm362_vm8 = vcmp.eq.s32.totalorder %v343_v10, %v351_v12 }
  0x16   : > { %1548 = vmatprep.subr.msk.bf16.mxu1 %vm1763_vm4, %v1683_v16  ;;  %vm1769_vm9 = vmpackc.low %vm358_vm3, %vm356_vm2  ;;  %vm365_vm10 = vcmp.eq.s32.totalorder %v344_v13, %v355_v11  ;;  %vm367_vm11 = vcmp.eq.s32.totalorder %v345_v14, %v355_v11  ;;  %vm364_vm15 = vcmp.eq.s32.totalorder %v344_v13, %v351_v12  ;;  %vm366_vm0 = vcmp.eq.s32.totalorder %v345_v14, %v351_v12 }
  0x17   : > { %1550 = vmatpush1.bf16.msk.msra.mxu1 %vm1769_vm9, %v1683_v16  ;;  %vm1775_vm12 = vmpackc.low %vm363_vm6, %vm361_vm5  ;;  %vm369_vm1 = vcmp.eq.s32.totalorder %v346_v18, %v355_v11  ;;  %vm371_vm2 = vcmp.eq.s32.totalorder %v347_v19, %v355_v11  ;;  %vm368_vm6 = vcmp.eq.s32.totalorder %v346_v18, %v351_v12  ;;  %v1545_v28 = vunpack.c.l.bf16 %v1544_v27 }
  0x18   : > { %1552 = vmatprep.subr.msk.bf16.mxu1 %vm1775_vm12, %v1683_v16  ;;  %vm1781_vm13 = vmpackc.low %vm362_vm8, %vm360_vm7  ;;  %vm370_vm7 = vcmp.eq.s32.totalorder %v347_v19, %v351_v12  ;;  %v1546_v29 = vunpack.c.h.bf16 %v1544_v27  ;;  %v581_v39 = vfloor.f32 %v579_v37  ;;  %v582_v44 = vmul.f32 16.0, %v580_v41  ;;  %v615_v37 = vld [vmem:[%s322_s24 + $0x8] sm:$0xff] }
  0x19   : > { %vm1785_vm14 = vmpackc.low %vm367_vm11, %vm365_vm10  ;;  %vm405_vm10 = vcmask 523264   ;;  %vm715_vm11 = vcmask 1042432   ;;  %v1686_v12 = vmov 100  }
  0x1a   : > { %vm1793_vm3 = vmpackc.low %vm366_vm0, %vm364_vm15  ;;  %v583_v43 = vmul.f32 16.0, %v581_v39  ;;  %v584_v47 = vsub.f32 %v574_v34, %v582_v44  ;;  %1651 = vset.pattern.permute.xlu0 %v1686_v12  ;;  %1652 = vset.pattern.permute.xlu1 %v1686_v12 }
  0x1b   : > { %1554 = vmatpush1.bf16.msk.msra.mxu1 %vm1781_vm13, %v1683_v16  ;;  %vm1797_vm5 = vmpackc.low %vm371_vm2, %vm369_vm1  ;;  %824 = vperm.xlu0 %1651, %v1743_v1  }
  0x1c   : > { %1556 = vmatprep.subr.msk.bf16.mxu1 %vm1785_vm14, %v1683_v16  ;;  %vm1805_vm8 = vmpackc.low %vm370_vm7, %vm368_vm6  ;;  %v585_v46 = vsub.f32 %v575_v33, %v583_v43  ;;  %828 = vperm.xlu1 %1652, %v1754_v4   ;;  %v621_v43 = vld [vmem:[%s322_s24 + $0x38] sm:$0xff]  ;;  %vm1043_vm7 = vcmask 261120  }
  0x1f   : > { %1558 = vmatpush1.bf16.msk.msra.mxu1 %vm1793_vm3, %v1683_v16  ;;  %938 = vrot.lane.b32.xlu0 %v1754_v4, %s1687_s14 }
  0x20   : > { %1560 = vmatprep.subr.msk.bf16.mxu1 %vm1797_vm5, %v1683_v16  ;;  %936 = vrot.lane.b32.xlu1 %v1743_v1, %s1687_s14 }
  0x21   : > { %1653 = vset.pattern.permute.xlu1 %v1688_v35  ;;  %1654 = vset.pattern.permute.xlu0 %v1688_v35 }
  0x23   : > { %1562 = vmatpush1.bf16.msk.msra.mxu1 %vm1805_vm8, %v1683_v16  ;;  %933 = vperm.xlu0 %1654, %v1754_v4  }
  0x24   : > { %1564 = vmatprep.subr.msk.bf16.mxu1 %vm1763_vm4, %v1683_v16  ;;  %vm608_vm4 = vcmask 1040384   ;;  %929 = vperm.xlu1 %1653, %v1743_v1  }
  0x26   : > { %1493 = vmatmul.mubr.msk.f32.vlgmr.msra.gmra.mrb[0].mxu1 %vm405_vm10, %v404_v26 }
  0x27   : > { %1566 = vmatpush1.bf16.msk.msra.mxu1 %vm1769_vm9, %v1683_v16  ;;  %554 = vmatprep.mubr.f32.mxu1 %v1681_v2  ;;  %vm611_vm9 = vcmask 1041408  }
  0x28   : > { %1568 = vmatprep.subr.msk.bf16.mxu1 %vm1775_vm12, %v1683_v16  ;;  %vm628_vm12 = vcmask 130048   ;;  %1035 = vrot.lane.b32.xlu1 %v1743_v1, %s1689_s25 }
  0x29   : > { %1039 = vrot.lane.b32.xlu0 %v1869_v36, %s1689_s25 }
  0x2b   : > { %1570 = vmatpush1.bf16.msk.msra.mxu1 %vm1781_vm13, %v1683_v16  ;;  %vm710_vm13 = vcmask 23552  }
  0x2c   : > { %1572 = vmatprep.subr.msk.bf16.mxu1 %vm1785_vm14, %v1683_v16  ;;  %1037 = vrot.lane.b32.xlu1 %v1754_v4, %s1689_s25 }
  0x2d   : > { %1141 = vrot.lane.b32.xlu0 %v1743_v1, %s1690_s26 }
  0x2f   : > { %1574 = vmatpush1.bf16.msk.msra.mxu1 %vm1793_vm3, %v1683_v16 }
  0x30   : > { %1576 = vmatprep.subr.msk.bf16.mxu1 %vm1797_vm5, %v1683_v16 }
  0x31   : > { %1145 = vrot.lane.b32.xlu0 %v1869_v36, %s1690_s26 }
  0x33   : > { %1578 = vmatpush1.bf16.msk.msra.mxu1 %vm1805_vm8, %v1683_v16 }
  0x36   : > { %1510 = vmatmul.mubr.msk.f32.vlgmr.msra.gmra.mrb[2].mxu1 %vm405_vm10, %v1545_v28 }
  0x37   : > { %560 = vmatprep.mubr.f32.mxu1 %v1681_v2 }
  0x3a   : > { %1511 = vmatmul.mubr.msk.f32.gmra.mrb[4].mxu1 %vm405_vm10, %v1546_v29 }
  0x3b   : > { %903 = vmatprep.mubr.f32.mxu1 %v1681_v2 }
  0x7a   : > { %v625_v5 = vpop.permute.xlu0 %624 }
  0x7e   : > { %v627_v11 = vpop.permute.xlu0 %626 }
  0x82   : > { %v832_v33 = vpop.permute.xlu0 %831 }
  0x88   : > { %v801_v13 = vpop.permute.xlu1 %800 }
  0x8c   : > { %v805_v18 = vpop.permute.xlu1 %804 }
  0x90   : > { %v834_v34 = vpop.permute.xlu1 %833 }
  0xf9   : > { %v475_v40 = vpop.f32.mrb[0].mxu1 }
  0xfa   : > { %v477_v42 = vpop.f32.mrb[1].mxu1  ;;  %v588_v48 = vsub.f32 %v475_v40, %v580_v41  ;;  %v586_v51 = vsub.f32 %v475_v40, %v584_v47  ;;  %v1591_v40 = vpack.c.bf16 %v617_v38, %v615_v37  ;;  %v616_v41 = vld [vmem:[%s322_s24 + $0x10] sm:$0xff] }
  0xfb   : > { %v589_v45 = vsub.f32 %v477_v42, %v581_v39  ;;  %v587_v50 = vsub.f32 %v477_v42, %v585_v46  ;;  %v614_v39 = vld [vmem:[%s322_s24] sm:$0xff]  ;;  %v619_v42 = vld [vmem:[%s322_s24 + $0x28] sm:$0xff]  ;;  %v620_v47 = vld [vmem:[%s322_s24 + $0x30] sm:$0xff] }
  0xfc   : > { %v592_v52 = vmul.f32 %v588_v48, %v588_v48  ;;  %v590_v55 = vmul.f32 %v586_v51, %v586_v51  ;;  %v609_v9 = vsel %vm608_vm4, %v586_v51, %v588_v48  ;;  %v1593_v44 = vpack.c.bf16 %v616_v41, %v614_v39  ;;  %v618_v46 = vld [vmem:[%s322_s24 + $0x20] sm:$0xff] }
  0xfd   : > { %v593_v49 = vmul.f32 %v589_v45, %v589_v45  ;;  %v591_v54 = vmul.f32 %v587_v50, %v587_v50  ;;  %v610_v7 = vsel %vm608_vm4, %v587_v50, %v589_v45  ;;  %v1595_v45 = vpack.c.bf16 %v621_v43, %v619_v42  ;;  %v825_v50 = vpop.permute.xlu0 %824 }
  0xfe   : > { %v596_v56 = vrot.slane %v592_v52, 1  ;;  %v1597_v48 = vpack.c.bf16 %v620_v47, %v618_v46 }
  0xff   : > { %v597_v53 = vrot.slane %v593_v49, 1  ;;  %v337_v49 = vld [vmem:[%s1923_s4 + $0x18] sm:$0xff] }
 0x100   : > { %v600_v60 = vadd.f32 %v596_v56, %v590_v55  ;;  %1041 = vrot.lane.b32.xlu1 %v337_v49, %s1689_s25  ;;  %v829_v55 = vpop.permute.xlu1 %828 }
 0x101   : > { %v601_v58 = vadd.f32 %v597_v53, %v591_v54 }
 0x102   : > { %v604_v6 = vrot.slane %v600_v60, 6 }
 0x103   : > { %v605_v62 = vrot.slane %v601_v58, 6 }
 0x104   : > { %v612_v10 = vsel %vm611_vm9, %v609_v9, %v604_v6  ;;  %1143 = vrot.lane.b32.xlu1 %v1754_v4, %s1690_s26  ;;  %v937_v9 = vpop.permute.xlu1 %936 }
 0x105   : > { %v613_v8 = vsel %vm611_vm9, %v610_v7, %v605_v62 }
 0x108   : > { %1147 = vrot.lane.b32.xlu1 %v337_v49, %s1690_s26 }
 0x109   : > { %v556_v57 = vpop.f32.mrb[2].mxu1 }
 0x10a   : > { %v558_v59 = vpop.f32.mrb[3].mxu1 }
 0x10d   : > { %v562_v61 = vpop.f32.mrb[4].mxu1 }
 0x10e   : > { %v1581_v63 = vpack.c.bf16 %v562_v61, %v556_v57  ;;  %v564_v0 = vpop.f32.mrb[5].mxu1 }
 0x10f   : > { %v1579_v3 = vpack.c.bf16 %v564_v0, %v558_v59 }
 0x111   : > { %1580 = vmatprep.subr.bf16.mxu0 %v1579_v3 }
 0x112   : > { %1582 = vmatpush1.bf16.msra.mxu0 %v1581_v63 }
 0x113   : > { %1514 = vmatprep.subr.msk.mxu0 %vm715_vm11, %v613_v8 }
 0x115   : > { %1512 = vmatmul.mubr.msk.f32.vlgmr.msra.gmra.mrb[0].mxu0 %vm628_vm12, %v625_v5 }
 0x116   : > { %1515 = vmatpush1.msk.msra.mxu0 %vm715_vm11, %v612_v10  ;;  %703 = vmatprep.mubr.f32.mxu0 %v1681_v2  ;;  %v939_v10 = vpop.permute.xlu0 %938 }
 0x117   : > { %1592 = vmatprep.subr.bf16.mxu0 %v1591_v40 }
 0x119   : > { %1513 = vmatmul.mubr.msk.f32.gmra.mrb[2].mxu0 %vm628_vm12, %v627_v11  ;;  %v930_v11 = vpop.permute.xlu1 %929 }
 0x11a   : > { %786 = vmatprep.mubr.f32.mxu0 %v1681_v2 }
 0x11d   : > { %1516 = vmatmul.mubr.msk.f32.vlgmr.msra.gmra.mrb[0].mxu0 %vm710_vm13, %v1743_v1  ;;  %v1036_v12 = vpop.permute.xlu1 %1035 }
 0x11e   : > { %792 = vmatprep.mubr.f32.mxu0 %v1681_v2  ;;  %1594 = vmatpush1.bf16.msra.mxu0 %v1593_v44 }
 0x11f   : > { %1596 = vmatprep.subr.bf16.mxu0 %v1595_v45 }
 0x121   : > { %1517 = vmatmul.mubr.msk.f32.gmra.mrb[2].mxu0 %vm710_vm13, %v1754_v4 }
 0x122   : > { %1116 = vmatprep.mubr.f32.mxu0 %v1681_v2  ;;  %1598 = vmatpush1.bf16.msra.mxu0 %v1597_v48 }
 0x125   : > { %1522 = vmatmul.mubr.msk.f32.vlgmr.msra.gmra.mrb[4].mxu0 %vm1043_vm7, %v1036_v12 }
 0x126   : > { %1122 = vmatprep.mubr.f32.mxu0 %v1681_v2 }
 0x1f0   : > { %v788_v14 = vpop.f32.mrb[0].mxu0 }
 0x1f1   : > { %v807_v15 = vadd.f32 %v801_v13, %v788_v14  ;;  %v790_v16 = vpop.f32.mrb[1].mxu0  ;;  %v934_v14 = vpop.permute.xlu0 %933 }
 0x1f2   : > { %v808_v17 = vadd.f32 %v801_v13, %v790_v16  ;;  %v1038_v13 = vpop.permute.xlu1 %1037 }
 0x1f3   : > { %v815_v20 = vmul.f32 0.1, %v807_v15  ;;  %vm811_vm14 = vcmp.ge.f32.partialorder %v807_v15, 0.0  ;;  %1523 = vmatmul.mubr.msk.f32.gmra.mrb[6].mxu0 %vm1043_vm7, %v1038_v13 }
 0x1f4   : > { %v794_v19 = vpop.f32.mrb[2].mxu0  ;;  %v816_v23 = vmul.f32 0.1, %v808_v17  ;;  %vm812_vm15 = vcmp.ge.f32.partialorder %v808_v17, 0.0  ;;  %1128 = vmatprep.mubr.f32.mxu0 %v1681_v2 }
 0x1f5   : > { %v809_v21 = vadd.f32 %v805_v18, %v794_v19  ;;  %v796_v22 = vpop.f32.mrb[3].mxu0  ;;  %v819_v27 = vsel %vm811_vm14, %v807_v15, %v815_v20  ;;  %v1040_v15 = vpop.permute.xlu0 %1039 }
 0x1f6   : > { %v810_v24 = vadd.f32 %v805_v18, %v796_v22  ;;  %v820_v30 = vsel %vm812_vm15, %v808_v17, %v816_v23  ;;  %v1042_v16 = vpop.permute.xlu1 %1041  ;;  %v1691_v17 = vmov 102  }
 0x1f7   : > { %vm813_vm0 = vcmp.ge.f32.partialorder %v809_v21, 0.0  ;;  %v817_v25 = vmul.f32 0.1, %v809_v21  ;;  %1524 = vmatmul.mubr.msk.f32.gmra.mrb[8].mxu0 %vm1043_vm7, %v1040_v15  ;;  %1655 = vset.pattern.permute.xlu0 %v1691_v17 }
 0x1f8   : > { %vm814_vm1 = vcmp.ge.f32.partialorder %v810_v24, 0.0  ;;  %v818_v26 = vmul.f32 0.1, %v810_v24  ;;  %1134 = vmatprep.mubr.f32.mxu0 %v1681_v2  ;;  %1656 = vset.pattern.permute.xlu1 %v1691_v17 }
 0x1f9   : > { %v821_v28 = vsel %vm813_vm0, %v809_v21, %v817_v25  ;;  %1247 = vperm.xlu0 %1655, %v1743_v1   ;;  %1251 = vperm.xlu1 %1656, %v1754_v4  }
 0x1fa   : > { %v1585_v29 = vpack.c.bf16 %v821_v28, %v819_v27  ;;  %v822_v31 = vsel %vm814_vm1, %v810_v24, %v818_v26  ;;  %v1144_v35 = vpop.permute.xlu1 %1143 }
 0x1fb   : > { %v1583_v32 = vpack.c.bf16 %v822_v31, %v820_v30  ;;  %1525 = vmatmul.mubr.msk.f32.gmra.mrb[10].mxu0 %vm1043_vm7, %v1042_v16 }
 0x1fc   : > { %1221 = vmatprep.mubr.f32.mxu0 %v1681_v2 }
 0x1fd   : > { %1584 = vmatprep.subr.bf16.mxu1 %v1583_v32  ;;  %1255 = vperm.xlu1 %1656, %v1869_v36  }
 0x1fe   : > { %1586 = vmatpush1.bf16.msra.mxu1 %v1585_v29  ;;  %1259 = vperm.xlu0 %1655, %v337_v49   ;;  %v1148_v37 = vpop.permute.xlu1 %1147 }
 0x201   : > { %1518 = vmatmul.mubr.msk.f32.vlgmr.msra.gmra.mrb[6].mxu1 %vm628_vm12, %v832_v33 }
 0x202   : > { %909 = vmatprep.mubr.f32.mxu1 %v1681_v2 }
 0x205   : > { %1519 = vmatmul.mubr.msk.f32.gmra.mrb[8].mxu1 %vm628_vm12, %v834_v34  ;;  %v1142_v34 = vpop.permute.xlu0 %1141 }
 0x206   : > { %1008 = vmatprep.mubr.f32.mxu1 %v1681_v2 }
 0x209   : > { %v1146_v36 = vpop.permute.xlu0 %1145 }
 0x278   : > { %v1248_v38 = vpop.permute.xlu0 %1247  ;;  %v1252_v40 = vpop.permute.xlu1 %1251 }
 0x2d4   : > { %v905_v51 = vpop.f32.mrb[6].mxu1 }
 0x2d5   : > { %v906_v52 = vadd.f32 %v905_v51, %v825_v50  ;;  %v907_v53 = vpop.f32.mrb[7].mxu1  ;;  %v1256_v51 = vpop.permute.xlu1 %1255 }
 0x2d6   : > { %v908_v54 = vadd.f32 %v907_v53, %v825_v50 }
 0x2d7   : > { %v920_v57 = vmul.f32 0.1, %v906_v52  ;;  %vm916_vm2 = vcmp.ge.f32.partialorder %v906_v52, 0.0 }
 0x2d8   : > { %v911_v56 = vpop.f32.mrb[8].mxu1  ;;  %v921_v60 = vmul.f32 0.1, %v908_v54  ;;  %vm917_vm3 = vcmp.ge.f32.partialorder %v908_v54, 0.0 }
 0x2d9   : > { %v912_v58 = vadd.f32 %v911_v56, %v829_v55  ;;  %v913_v59 = vpop.f32.mrb[9].mxu1  ;;  %v924_v0 = vsel %vm916_vm2, %v906_v52, %v920_v57 }
 0x2da   : > { %v914_v61 = vadd.f32 %v913_v59, %v829_v55  ;;  %v925_v6 = vsel %vm917_vm3, %v908_v54, %v921_v60 }
 0x2db   : > { %vm918_vm5 = vcmp.ge.f32.partialorder %v912_v58, 0.0  ;;  %v922_v62 = vmul.f32 0.1, %v912_v58 }
 0x2dc   : > { %vm919_vm6 = vcmp.ge.f32.partialorder %v914_v61, 0.0  ;;  %v923_v63 = vmul.f32 0.1, %v914_v61 }
 0x2dd   : > { %v926_v3 = vsel %vm918_vm5, %v912_v58, %v922_v62 }
 0x2de   : > { %v1589_v5 = vpack.c.bf16 %v926_v3, %v924_v0  ;;  %v927_v7 = vsel %vm919_vm6, %v914_v61, %v923_v63  ;;  %v1260_v0 = vpop.permute.xlu0 %1259 }
 0x2df   : > { %v1587_v8 = vpack.c.bf16 %v927_v7, %v925_v6 }
 0x2e1   : > { %1588 = vmatprep.subr.bf16.mxu1 %v1587_v8 }
 0x2e2   : > { %1590 = vmatpush1.bf16.msra.mxu1 %v1589_v5 }
 0x2e5   : > { %1520 = vmatmul.mubr.msk.f32.vlgmr.msra.gmra.mrb[10].mxu1 %vm628_vm12, %v937_v9 }
 0x2e6   : > { %1014 = vmatprep.mubr.f32.mxu1 %v1681_v2 }
 0x2e9   : > { %1521 = vmatmul.mubr.msk.f32.gmra.mrb[12].mxu1 %vm628_vm12, %v939_v10 }
 0x3b8   : > { %v1010_v18 = vpop.f32.mrb[10].mxu1 }
 0x3b9   : > { %v1011_v19 = vadd.f32 %v1010_v18, %v930_v11  ;;  %v1012_v20 = vpop.f32.mrb[11].mxu1 }
 0x3ba   : > { %v1013_v21 = vadd.f32 %v1012_v20, %v930_v11 }
 0x3bb   : > { %v1025_v23 = vmul.f32 0.1, %v1011_v19  ;;  %vm1021_vm8 = vcmp.ge.f32.partialorder %v1011_v19, 0.0 }
 0x3bc   : > { %v1016_v22 = vpop.f32.mrb[12].mxu1  ;;  %v1026_v26 = vmul.f32 0.1, %v1013_v21  ;;  %vm1022_vm10 = vcmp.ge.f32.partialorder %v1013_v21, 0.0 }
 0x3bd   : > { %v1017_v24 = vadd.f32 %v1016_v22, %v934_v14  ;;  %v1018_v25 = vpop.f32.mrb[13].mxu1  ;;  %v1029_v4 = vsel %vm1021_vm8, %v1011_v19, %v1025_v23 }
 0x3be   : > { %v1019_v27 = vadd.f32 %v1018_v25, %v934_v14  ;;  %v1030_v31 = vsel %vm1022_vm10, %v1013_v21, %v1026_v26 }
 0x3bf   : > { %vm1023_vm4 = vcmp.ge.f32.partialorder %v1017_v24, 0.0  ;;  %v1027_v28 = vmul.f32 0.1, %v1017_v24 }
 0x3c0   : > { %vm1024_vm9 = vcmp.ge.f32.partialorder %v1019_v27, 0.0  ;;  %v1028_v1 = vmul.f32 0.1, %v1019_v27 }
 0x3c1   : > { %v1031_v29 = vsel %vm1023_vm4, %v1017_v24, %v1027_v28 }
 0x3c2   : > { %v1601_v30 = vpack.c.bf16 %v1031_v29, %v1029_v4  ;;  %v1032_v32 = vsel %vm1024_vm9, %v1019_v27, %v1028_v1 }
 0x3c3   : > { %v1599_v33 = vpack.c.bf16 %v1032_v32, %v1030_v31 }
 0x3c5   : > { %1600 = vmatprep.subr.bf16.mxu0 %v1599_v33 }
 0x3c6   : > { %1602 = vmatpush1.bf16.msra.mxu0 %v1601_v30 }
 0x3c9   : > { %1526 = vmatmul.mubr.msk.f32.vlgmr.msra.gmra.mrb[4].mxu0 %vm628_vm12, %v1142_v34 }
 0x3ca   : > { %1227 = vmatprep.mubr.f32.mxu0 %v1681_v2 }
 0x3cd   : > { %1527 = vmatmul.mubr.msk.f32.gmra.mrb[6].mxu0 %vm628_vm12, %v1144_v35 }
 0x3ce   : > { %1233 = vmatprep.mubr.f32.mxu0 %v1681_v2 }
 0x3d1   : > { %1528 = vmatmul.mubr.msk.f32.gmra.mrb[8].mxu0 %vm628_vm12, %v1146_v36 }
 0x3d2   : > { %1239 = vmatprep.mubr.f32.mxu0 %v1681_v2 }
 0x3d5   : > { %1529 = vmatmul.mubr.msk.f32.gmra.mrb[10].mxu0 %vm628_vm12, %v1148_v37 }
 0x49c   : > { %v1223_v39 = vpop.f32.mrb[4].mxu0 }
 0x49d   : > { %v1262_v41 = vadd.f32 %v1248_v38, %v1223_v39  ;;  %v1225_v42 = vpop.f32.mrb[5].mxu0 }
 0x49e   : > { %v1263_v43 = vadd.f32 %v1248_v38, %v1225_v42 }
 0x49f   : > { %vm1270_vm11 = vcmp.ge.f32.partialorder %v1262_v41, 0.0  ;;  %v1278_v44 = vmul.f32 0.1, %v1262_v41 }
 0x4a0   : > { %vm1271_vm13 = vcmp.ge.f32.partialorder %v1263_v43, 0.0  ;;  %v1279_v45 = vmul.f32 0.1, %v1263_v43  ;;  %v1229_v46 = vpop.f32.mrb[6].mxu0 }
 0x4a1   : > { %v1286_v47 = vsel %vm1270_vm11, %v1262_v41, %v1278_v44  ;;  %v1264_v48 = vadd.f32 %v1252_v40, %v1229_v46  ;;  %v1231_v49 = vpop.f32.mrb[7].mxu0 }
 0x4a2   : > { %v1287_v2 = vsel %vm1271_vm13, %v1263_v43, %v1279_v45  ;;  %v1265_v50 = vadd.f32 %v1252_v40, %v1231_v49 }
 0x4a3   : > { %v1539_v52 = vpack.c.bf16 %v1287_v2, %v1286_v47  ;;  %vm1272_vm12 = vcmp.ge.f32.partialorder %v1264_v48, 0.0  ;;  %v1280_v53 = vmul.f32 0.1, %v1264_v48 }
 0x4a4   : > { %vm1273_vm14 = vcmp.ge.f32.partialorder %v1265_v50, 0.0  ;;  %v1281_v54 = vmul.f32 0.1, %v1265_v50  ;;  %v1235_v55 = vpop.f32.mrb[8].mxu0 }
 0x4a5   : > { %1318 = vst [vmem:[%s1904_s7] sm:$0xff] %v1539_v52  ;;  %v1288_v56 = vsel %vm1272_vm12, %v1264_v48, %v1280_v53  ;;  %v1266_v57 = vadd.f32 %v1256_v51, %v1235_v55  ;;  %v1237_v58 = vpop.f32.mrb[9].mxu0 }
 0x4a6   : > { %v1289_v59 = vsel %vm1273_vm14, %v1265_v50, %v1281_v54  ;;  %v1267_v60 = vadd.f32 %v1256_v51, %v1237_v58 }
 0x4a7   : > { %v1540_v61 = vpack.c.bf16 %v1289_v59, %v1288_v56  ;;  %vm1274_vm15 = vcmp.ge.f32.partialorder %v1266_v57, 0.0  ;;  %v1282_v62 = vmul.f32 0.1, %v1266_v57 }
 0x4a8   : > { %vm1275_vm0 = vcmp.ge.f32.partialorder %v1267_v60, 0.0  ;;  %v1283_v63 = vmul.f32 0.1, %v1267_v60  ;;  %v1241_v3 = vpop.f32.mrb[10].mxu0 }
 0x4a9   : > { %1319 = vst [vmem:[%s1904_s7 + $0x8] sm:$0xff] %v1540_v61  ;;  %v1290_v5 = vsel %vm1274_vm15, %v1266_v57, %v1282_v62  ;;  %v1268_v6 = vadd.f32 %v1260_v0, %v1241_v3  ;;  %v1243_v7 = vpop.f32.mrb[11].mxu0 }
 0x4aa   : > { %v1291_v8 = vsel %vm1275_vm0, %v1267_v60, %v1283_v63  ;;  %v1269_v9 = vadd.f32 %v1260_v0, %v1243_v7 }
 0x4ab   : > { %v1541_v10 = vpack.c.bf16 %v1291_v8, %v1290_v5  ;;  %vm1276_vm1 = vcmp.ge.f32.partialorder %v1268_v6, 0.0  ;;  %v1284_v11 = vmul.f32 0.1, %v1268_v6 }
 0x4ac   : > { %vm1277_vm2 = vcmp.ge.f32.partialorder %v1269_v9, 0.0  ;;  %v1285_v12 = vmul.f32 0.1, %v1269_v9 }
 0x4ad   : > { %1320 = vst [vmem:[%s1904_s7 + $0x10] sm:$0xff] %v1541_v10  ;;  %v1292_v13 = vsel %vm1276_vm1, %v1268_v6, %v1284_v11 }
 0x4ae   : > { %v1293_v14 = vsel %vm1277_vm2, %v1269_v9, %v1285_v12 }
 0x4af   : > { %v1542_v15 = vpack.c.bf16 %v1293_v14, %v1292_v13 }
 0x4b1   : > { %1321 = vst [vmem:[%s1904_s7 + $0x18] sm:$0xff] %v1542_v15 }
 0x4b2 PF: > { %s15_s20 = sadd.s32 1, %s1679_s20   ;;  %s1941_s18 = smov %s1675_s19 }
 0x4b3   : > { %p12_p5 = scmp.ge.s32.totalorder %s15_s20, 4   ;;  %s1942_s19 = smov %s1944_s21 }
 0x4b5   :  { %14 = sbr.rel (!%p12_p5) target bundleno = 2 (0x2), region = 79 }

</bundles_post_ra>
